<compile_context>
chip_gen: v6e
topology: v6e:2x2x1
jax: 0.10.0
libtpu: 0.0.40
codegen_flags: <defaults>
</compile_context>

<pallas_src>
import jax
import jax.numpy as jnp
from jax.experimental import pallas as pl
from jax.experimental.pallas import tpu as pltpu


def mlp_kernel(x_ref, w1_ref, b1_ref, w2_ref, b2_ref, w3t_ref, b3_ref, o_ref):
    """Fused 3-layer MLP forward on one batch tile.

    x_ref:  (TILE_B, D_in)  compute dtype (bf16 or f32)
    w1_ref: (D_in, 32), w2_ref: (32, 16)         -- (in, out) layout
    w3t_ref: (1, 16)                             -- PyTorch (out, in) layout
    b*_ref: (1, n) float32
    o_ref:  (1, 1, TILE_B) float32               -- batch on the lane axis
    """
    x = x_ref[...]                                                      # (B, D)
    # Layer 1: MXU matmul, f32 accumulation; bias+ReLU stay in f32 (VPU).
    h1 = jnp.dot(x, w1_ref[...], preferred_element_type=jnp.float32)   # (B, 32)
    h1 = jnp.maximum(h1 + b1_ref[...], 0.0)
    h1 = h1.astype(w2_ref.dtype)          # downcast only right before the dot
    # Layer 2.
    h2 = jnp.dot(h1, w2_ref[...], preferred_element_type=jnp.float32)  # (B, 16)
    h2 = jnp.maximum(h2 + b2_ref[...], 0.0)
    h2 = h2.astype(w3t_ref.dtype)
    # Layer 3 (16 -> 1): contract both operands on their last dim (q @ k^T
    # pattern) so the result is (1, TILE_B) -- batch lands on the lane axis and
    # the output store is lane-dense (no masked last-dim-1 stores).
    y_t = jax.lax.dot_general(
        w3t_ref[...], h2,
        dimension_numbers=(((1,), (1,)), ((), ())),
        preferred_element_type=jnp.float32)                             # (1, B)
    o_ref[...] = (y_t + b3_ref[...]).reshape(o_ref.shape).astype(o_ref.dtype)


def _round_up(n, m):
    return ((n + m - 1) // m) * m


def simple_model_forward(x, params, *, compute_dtype=jnp.bfloat16,
                         max_tile_b=1024):
    """x: (B, input_dim) float32. params: dict from init_params."""
    assert max_tile_b % 128 == 0, "tile must be sublane/lane aligned"
    B, D = x.shape

    # Tile the batch. Whenever more than one tile is needed, tile_b is
    # max_tile_b (a multiple of 8 and 128), keeping BlockSpecs aligned.
    tile_b = min(max_tile_b, _round_up(B, 8))
    b_pad = _round_up(B, tile_b)
    num_tiles = b_pad // tile_b

    x = x.astype(compute_dtype)
    if b_pad != B:
        x = jnp.pad(x, ((0, b_pad - B), (0, 0)))   # zero rows -> discarded below

    w1 = params["w1"].astype(compute_dtype)
    w2 = params["w2"].astype(compute_dtype)
    w3t = params["w3t"].astype(compute_dtype)
    b1 = params["b1"].astype(jnp.float32)
    b2 = params["b2"].astype(jnp.float32)
    b3 = params["b3"].astype(jnp.float32)

    # Weights/biases: whole-array blocks with a constant index_map -> fetched
    # once, resident in VMEM across all grid steps.
    def resident(a):
        return pl.BlockSpec(a.shape, lambda i: (0,) * a.ndim)

    grid_spec = pltpu.PrefetchScalarGridSpec(
        num_scalar_prefetch=0,
        grid=(num_tiles,),
        in_specs=[
            pl.BlockSpec((tile_b, D), lambda i: (i, 0)),   # x: streamed tiles
            resident(w1), resident(b1),
            resident(w2), resident(b2),
            resident(w3t), resident(b3),
        ],
        out_specs=pl.BlockSpec((1, 1, tile_b), lambda i: (i, 0, 0)),
    )

    out = pl.pallas_call(
        mlp_kernel,
        out_shape=jax.ShapeDtypeStruct((num_tiles, 1, tile_b), jnp.float32),
        grid_spec=grid_spec,
        compiler_params=pltpu.CompilerParams(
            dimension_semantics=("parallel",)),   # megacore sharding on v7x
    )(x, w1, b1, w2, b2, w3t, b3)

    # (num_tiles, 1, tile_b) -> (b_pad, 1), drop padded rows.
    return out.reshape(b_pad, 1)[:B]


def init_params(key, input_dim=50, hidden_dims=(32, 16)):
    """U(-1/sqrt(fan_in), +1/sqrt(fan_in)) == PyTorch nn.Linear default bounds."""
    dims = [input_dim] + list(hidden_dims) + [1]
    params = {}
    for i in range(len(dims) - 1):
        fan_in, fan_out = dims[i], dims[i + 1]
        key, kw, kb = jax.random.split(key, 3)
        bound = 1.0 / (fan_in ** 0.5)
        w = jax.random.uniform(kw, (fan_in, fan_out), jnp.float32, -bound, bound)
        b = jax.random.uniform(kb, (1, fan_out), jnp.float32, -bound, bound)
        if i == len(dims) - 2:
            params["w3t"] = w.T            # final layer kept in (out, in) layout
        else:
            params[f"w{i + 1}"] = w
        params[f"b{i + 1}"] = b
    return params


def reference_forward(x, params):
    """Plain-JAX f32 reference (matches the PyTorch module's forward)."""
    h = jnp.maximum(x @ params["w1"] + params["b1"], 0.0)
    h = jnp.maximum(h @ params["w2"] + params["b2"], 0.0)
    return h @ params["w3t"].T + params["b3"]


if __name__ == "__main__":
    key = jax.random.PRNGKey(0)
    key, kx = jax.random.split(key)

    batch, input_dim = 8, 50
    params = init_params(key, input_dim=input_dim, hidden_dims=(32, 16))
    x = jax.random.normal(kx, (batch, input_dim), jnp.float32)
    ref = reference_forward(x, params)

    # f32 compute path: exact parity with the PyTorch/JAX reference.
    out_f32 = jax.block_until_ready(
        simple_model_forward(x, params, compute_dtype=jnp.float32))
    assert out_f32.shape == (batch, 1), out_f32.shape
    assert jnp.allclose(out_f32, ref, atol=1e-5, rtol=1e-5), "f32 mismatch"

    # Default bf16 path (halved HBM traffic, native MXU dtype): loose check.
    out_bf16 = jax.block_until_ready(simple_model_forward(x, params))
    assert out_bf16.shape == (batch, 1), out_bf16.shape
    assert jnp.allclose(out_bf16, ref, atol=5e-2, rtol=5e-2), "bf16 mismatch"

    # Exercise a multi-tile grid + batch padding (B=300 with 128-row tiles).
    kx2 = jax.random.PRNGKey(1)
    x2 = jax.random.normal(kx2, (300, input_dim), jnp.float32)
    ref2 = reference_forward(x2, params)
    out2 = jax.block_until_ready(
        simple_model_forward(x2, params, compute_dtype=jnp.float32,
                             max_tile_b=128))
    assert out2.shape == (300, 1), out2.shape
    assert jnp.allclose(out2, ref2, atol=1e-5, rtol=1e-5), "multi-tile mismatch"

    # NB: at batch=8 this call is fixed-overhead bound; the grid/tiling pays
    # off for large batches (the smoke test here is for correctness only).
    print("KERNEL_OK")
</pallas_src>

<mosaic_0001>
module attributes {stable_mosaic.version = 11 : i64} {
  func.func @mlp_kernel(%arg0: i32, %arg1: memref<8x50xf32, #tpu.memory_space<vmem>>, %arg2: memref<50x32xf32, #tpu.memory_space<vmem>>, %arg3: memref<1x32xf32, #tpu.memory_space<vmem>>, %arg4: memref<32x16xf32, #tpu.memory_space<vmem>>, %arg5: memref<1x16xf32, #tpu.memory_space<vmem>>, %arg6: memref<1x16xf32, #tpu.memory_space<vmem>>, %arg7: memref<1x1xf32, #tpu.memory_space<vmem>>, %arg8: memref<1x1x8xf32, #tpu.memory_space<vmem>>) attributes {dimension_semantics = [#tpu.dimension_semantics<parallel>], iteration_bounds = array<i64: 1>, scalar_prefetch = 0 : i64, scratch_operands = 0 : i64, tpu.core_type = #tpu.core_type<tc>, window_params = [{transform_indices = @transform_0, window_bounds = array<i64: 8, 50>}, {pipeline_mode = #tpu.pipeline_mode<synchronous>, transform_indices = @transform_1, window_bounds = array<i64: 50, 32>}, {pipeline_mode = #tpu.pipeline_mode<synchronous>, transform_indices = @transform_2, window_bounds = array<i64: 1, 32>}, {pipeline_mode = #tpu.pipeline_mode<synchronous>, transform_indices = @transform_3, window_bounds = array<i64: 32, 16>}, {pipeline_mode = #tpu.pipeline_mode<synchronous>, transform_indices = @transform_4, window_bounds = array<i64: 1, 16>}, {pipeline_mode = #tpu.pipeline_mode<synchronous>, transform_indices = @transform_5, window_bounds = array<i64: 1, 16>}, {pipeline_mode = #tpu.pipeline_mode<synchronous>, transform_indices = @transform_6, window_bounds = array<i64: 1, 1>}, {transform_indices = @transform_7, window_bounds = array<i64: 1, 1, 8>}]} {
    %c0 = arith.constant 0 : index
    %c0_0 = arith.constant 0 : index
    %0 = vector.load %arg1[%c0, %c0_0] : memref<8x50xf32, #tpu.memory_space<vmem>>, vector<8x50xf32>
    %c0_1 = arith.constant 0 : index
    %c0_2 = arith.constant 0 : index
    %1 = vector.load %arg2[%c0_1, %c0_2] : memref<50x32xf32, #tpu.memory_space<vmem>>, vector<50x32xf32>
    %cst = arith.constant dense<0.000000e+00> : vector<8x32xf32>
    %2 = tpu.matmul %0, %1, %cst {dimension_numbers = #tpu.dot_dimension_numbers<[1], [0], [0], [1], [0, 0, 1, 1], [], []>} : vector<8x50xf32>, vector<50x32xf32>, vector<8x32xf32> -> vector<8x32xf32>
    %c0_3 = arith.constant 0 : index
    %c0_4 = arith.constant 0 : index
    %3 = vector.load %arg3[%c0_3, %c0_4] : memref<1x32xf32, #tpu.memory_space<vmem>>, vector<1x32xf32>
    %4 = vector.broadcast %3 : vector<1x32xf32> to vector<8x32xf32>
    %5 = arith.addf %2, %4 : vector<8x32xf32>
    %cst_5 = arith.constant 0.000000e+00 : f32
    %6 = vector.broadcast %cst_5 : f32 to vector<8x32xf32>
    %7 = arith.maximumf %5, %6 : vector<8x32xf32>
    %c0_6 = arith.constant 0 : index
    %c0_7 = arith.constant 0 : index
    %8 = vector.load %arg4[%c0_6, %c0_7] : memref<32x16xf32, #tpu.memory_space<vmem>>, vector<32x16xf32>
    %cst_8 = arith.constant dense<0.000000e+00> : vector<8x16xf32>
    %9 = tpu.matmul %7, %8, %cst_8 {dimension_numbers = #tpu.dot_dimension_numbers<[1], [0], [0], [1], [0, 0, 1, 1], [], []>} : vector<8x32xf32>, vector<32x16xf32>, vector<8x16xf32> -> vector<8x16xf32>
    %c0_9 = arith.constant 0 : index
    %c0_10 = arith.constant 0 : index
    %10 = vector.load %arg5[%c0_9, %c0_10] : memref<1x16xf32, #tpu.memory_space<vmem>>, vector<1x16xf32>
    %11 = vector.broadcast %10 : vector<1x16xf32> to vector<8x16xf32>
    %12 = arith.addf %9, %11 : vector<8x16xf32>
    %cst_11 = arith.constant 0.000000e+00 : f32
    %13 = vector.broadcast %cst_11 : f32 to vector<8x16xf32>
    %14 = arith.maximumf %12, %13 : vector<8x16xf32>
    %c0_12 = arith.constant 0 : index
    %c0_13 = arith.constant 0 : index
    %15 = vector.load %arg6[%c0_12, %c0_13] : memref<1x16xf32, #tpu.memory_space<vmem>>, vector<1x16xf32>
    %cst_14 = arith.constant dense<0.000000e+00> : vector<1x8xf32>
    %16 = tpu.matmul %15, %14, %cst_14 {dimension_numbers = #tpu.dot_dimension_numbers<[1], [1], [0], [0], [0, 0, 1, 0], [], []>} : vector<1x16xf32>, vector<8x16xf32>, vector<1x8xf32> -> vector<1x8xf32>
    %c0_15 = arith.constant 0 : index
    %c0_16 = arith.constant 0 : index
    %17 = vector.load %arg7[%c0_15, %c0_16] : memref<1x1xf32, #tpu.memory_space<vmem>>, vector<1x1xf32>
    %18 = vector.broadcast %17 : vector<1x1xf32> to vector<1x8xf32>
    %19 = arith.addf %16, %18 : vector<1x8xf32>
    %20 = vector.shape_cast %19 : vector<1x8xf32> to vector<1x1x8xf32>
    %c0_17 = arith.constant 0 : index
    %c0_18 = arith.constant 0 : index
    %c0_19 = arith.constant 0 : index
    %21 = vector.load %arg8[%c0_17, %c0_18, %c0_19] : memref<1x1x8xf32, #tpu.memory_space<vmem>>, vector<1x1x8xf32>
    tpu.vector_store %arg8[%c0_17, %c0_18, %c0_19], %20 {strides = array<i32>} : memref<1x1x8xf32, #tpu.memory_space<vmem>>, vector<1x1x8xf32>,
    return
  }
  func.func @transform_0(%arg0: i32) -> (i32, i32) {
    %c0_i32 = arith.constant 0 : i32
    %c0_i32_0 = arith.constant 0 : i32
    return %arg0, %c0_i32 : i32, i32
  }
  func.func @transform_1(%arg0: i32) -> (i32, i32) {
    %c0_i32 = arith.constant 0 : i32
    %c0_i32_0 = arith.constant 0 : i32
    %c0_i32_1 = arith.constant 0 : i32
    return %c0_i32, %c0_i32_0 : i32, i32
  }
  func.func @transform_2(%arg0: i32) -> (i32, i32) {
    %c0_i32 = arith.constant 0 : i32
    %c0_i32_0 = arith.constant 0 : i32
    %c0_i32_1 = arith.constant 0 : i32
    return %c0_i32, %c0_i32_0 : i32, i32
  }
  func.func @transform_3(%arg0: i32) -> (i32, i32) {
    %c0_i32 = arith.constant 0 : i32
    %c0_i32_0 = arith.constant 0 : i32
    %c0_i32_1 = arith.constant 0 : i32
    return %c0_i32, %c0_i32_0 : i32, i32
  }
  func.func @transform_4(%arg0: i32) -> (i32, i32) {
    %c0_i32 = arith.constant 0 : i32
    %c0_i32_0 = arith.constant 0 : i32
    %c0_i32_1 = arith.constant 0 : i32
    return %c0_i32, %c0_i32_0 : i32, i32
  }
  func.func @transform_5(%arg0: i32) -> (i32, i32) {
    %c0_i32 = arith.constant 0 : i32
    %c0_i32_0 = arith.constant 0 : i32
    %c0_i32_1 = arith.constant 0 : i32
    return %c0_i32, %c0_i32_0 : i32, i32
  }
  func.func @transform_6(%arg0: i32) -> (i32, i32) {
    %c0_i32 = arith.constant 0 : i32
    %c0_i32_0 = arith.constant 0 : i32
    %c0_i32_1 = arith.constant 0 : i32
    return %c0_i32, %c0_i32_0 : i32, i32
  }
  func.func @transform_7(%arg0: i32) -> (i32, i32, i32) {
    %c0_i32 = arith.constant 0 : i32
    %c0_i32_0 = arith.constant 0 : i32
    %c0_i32_1 = arith.constant 0 : i32
    return %arg0, %c0_i32, %c0_i32_0 : i32, i32, i32
  }
}

</mosaic_0001>

<bundles_post_ra>
// kernel: tpu_custom_call.1
= control target key start
LH: loop header
LB: loop body
LE: loop exit
PB: predicated region body
PF: predicated region fallthrough
CT: control target
= control target key end

     0   :  { %s493_s0 = inlined_call_operand.vmem [shape: f32[8,50], index: 0, kind: input, shape index: {}]   ;;  %s494_s1 = inlined_call_operand.vmem [shape: f32[50,32], index: 1, kind: input, shape index: {}]   ;;  %s495_s2 = inlined_call_operand.vmem [shape: f32[1,32], index: 2, kind: input, shape index: {}]   ;;  %s496_s3 = inlined_call_operand.vmem [shape: f32[32,16], index: 3, kind: input, shape index: {}]   ;;  %s497_s4 = inlined_call_operand.vmem [shape: f32[1,16], index: 4, kind: input, shape index: {}]   ;;  %s498_s5 = inlined_call_operand.vmem [shape: f32[1,16], index: 5, kind: input, shape index: {}]   ;;  %s499_s6 = inlined_call_operand.<no memory space> [shape: f32[1,1], index: 6, kind: input, shape index: {}]   ;;  %s500_s7 = inlined_call_operand.hbm [shape: f32[1,1,8], index: 7, kind: output, shape index: {}]  }
   0x1   :  { %v12_v0 = vstv %s499_s6 }
   0x2   :  { %13 = vst [vmem:[#allocation2] sm:$0x1] %v12_v0 }
   0x3   :  { %v36_v1 = vld [vmem:[%s494_s1 + $0x30] sm:$0x3]  ;;  %vm48_vm0 = vcmask 1041408   ;;  %v395_v2 = vmov 0.0   ;;  %v35_v3 = vld [vmem:[%s494_s1 + $0x28] sm:$0xff]  ;;  %vm396_vm1 = vmmov 0  }
   0x4   :  { %335 = vmatprep.subr.mxu0 %v395_v2  ;;  %352 = vmatprep.subr.mxu1 %v395_v2  ;;  %v126_v4 = vld [vmem:[%s496_s3 + $0x18] sm:$0xff]  ;;  %v34_v5 = vld [vmem:[%s494_s1 + $0x20] sm:$0xff] }
   0x5   :  { %336 = vmatpush3.msk.msra.mxu0 %vm48_vm0, %v36_v1  ;;  %349 = vmatprep.mubr.msk.f32.mxu0 %vm396_vm1, %v395_v2 }
   0x6   :  { %337 = vmatprep.subr.mxu0 %v395_v2  ;;  %353 = vmatpush3.msra.mxu1 %v126_v4 }
   0x7   :  { %14 = vsyncpa [#allocation4], 0  ;;  %338 = vmatpush3.msra.mxu0 %v35_v3  ;;  %354 = vmatprep.subr.mxu1 %v395_v2  ;;  %v33_v6 = vld [vmem:[%s494_s1 + $0x18] sm:$0xff]  ;;  %v32_v7 = vld [vmem:[%s494_s1 + $0x10] sm:$0xff]  ;;  %vm44_vm2 = vcmask 408576   ;;  %vm134_vm3 = vcmask 261120   ;;  %v216_v27 = vlaneseq }
   0x8   :  { %339 = vmatprep.subr.mxu0 %v395_v2  ;;  %360 = vmatprep.mubr.msk.f32.mxu1 %vm396_vm1, %v395_v2  ;;  %v31_v8 = vld [vmem:[%s494_s1 + $0x8] sm:$0xff]  ;;  %v30_v9 = vld [vmem:[%s494_s1] sm:$0xff]  ;;  %v125_v11 = vld [vmem:[%s496_s3 + $0x10] sm:$0xff]  ;;  %v397_v20 = vmov 0   ;;  %vm220_vm4 = vcmask 130048   ;;  %s398_s28 = smov [#allocation3]  }
   0x9   :  { %340 = vmatpush3.msra.mxu0 %v34_v5  ;;  %v29_v10 = vld [vmem:[%s493_s0] sm:$0xff]  ;;  %355 = vmatpush3.msra.mxu1 %v125_v11  ;;  %v124_v12 = vld [vmem:[%s496_s3 + $0x8] sm:$0xff]  ;;  %v217_v28 = vshrl.u32 %v216_v27, 7  ;;  %s305_s29 = sshll.u32 %s398_s28, 4  ;;  %vm297_vm5 = vcmask 57344   ;;  %s306_s29 = int_to_ptr.vmem [resolvable:$true] %s305_s29 }
   0xa   :  { %341 = vmatprep.subr.mxu0 %v395_v2  ;;  %356 = vmatprep.subr.mxu1 %v395_v2  ;;  %v123_v13 = vld [vmem:[%s496_s3] sm:$0xff]  ;;  %s377_s30 = scalar_lea.vmem %s306_s29, 32  ;;  %p378_p1 = scmp.lt.s32.totalorder %s306_s29, %s306_s29 }
   0xb   :  { %342 = vmatpush3.msra.mxu0 %v33_v6  ;;  %357 = vmatpush3.msra.mxu1 %v124_v12  ;;  %v313_v14 = vld [vmem:[%s495_s2] ss:$0 sm:$0xff]  ;;  %v218_v29 = vsub.s32 0, %v217_v28 }
   0xc   :  { %343 = vmatprep.subr.mxu0 %v395_v2  ;;  %358 = vmatprep.subr.mxu1 %v395_v2  ;;  %v210_v19 = vld [vmem:[#allocation2] sm:$0x1] }
   0xd   :  { %344 = vmatpush3.msra.mxu0 %v32_v7  ;;  %359 = vmatpush3.msra.mxu1 %v123_v13  ;;  %v316_v21 = vld [vmem:[%s497_s4] ss:$0 sm:$0xff]  ;;  %s373_s4 = scalar_lea.vmem %s306_s29, 16 }
   0xe   :  { %345 = vmatprep.subr.mxu0 %v395_v2  ;;  %363 = vmatprep.subr.mxu1 %v395_v2  ;;  %v209_v26 = vld [vmem:[%s498_s5] sm:$0x1]  ;;  %p374_p0 = scmp.ne.s32.totalorder %s306_s29, %s373_s4  ;;  %p379_p2 = scmp.lt.s32.totalorder %s377_s30, %s373_s4 }
   0xf   :  { %346 = vmatpush3.msra.mxu0 %v31_v8  ;;  %372 = vset.pattern.permute.xlu0 %v397_v20 }
  0x10   :  { %347 = vmatprep.subr.mxu0 %v395_v2  ;;  %213 = vperm.xlu0 %372, %v210_v19   ;;  %p380_p3 = por %p379_p2, %p378_p1 }
  0x11   :  { %348 = vmatpush3.msra.mxu0 %v30_v9 }
  0x12   :  { %350 = vmatmul.mubr.msk.f32.vlgmr.msra.gmra.mxu0 %vm44_vm2, %v29_v10  ;;  %p381_p4 = pnand %p380_p3, %p374_p0 }
  0x8b   :  { %v214_v30 = vpop.permute.xlu0 %213 }
  0x8c   :  { %v219_v31 = vrot.slane %v214_v30, %v218_v29 }
  0xd2   :  { %v118_v15 = vpop.f32.mrf.mxu0 }
  0xd3   :  { %v119_v16 = vadd.f32 %v313_v14, %v118_v15 }
  0xd4   :  { %v351_v17 = vpop.f32.mrf.mxu0 }
  0xd5   :  { %v122_v18 = vmax.f32 %v119_v16, 0.0 }
  0xd7   :  { %361 = vmatmul.mubr.msk.f32.vlgmr.msra.gmra.mxu1 %vm134_vm3, %v122_v18 }
  0xd8   :  { %365 = vmatprep.mubr.msk.f32.mxu1 %vm396_vm1, %v395_v2 }
 0x197   :  { %v204_v22 = vpop.f32.mrf.mxu1 }
 0x198   :  { %v205_v23 = vadd.f32 %v316_v21, %v204_v22 }
 0x199   :  { %v362_v24 = vpop.f32.mrf.mxu1 }
 0x19a   :  { %v208_v25 = vmax.f32 %v205_v23, 0.0 }
 0x19c   :  { %364 = vmatpush3.xpose.msk.msra.mxu1 %vm220_vm4, %v208_v25 }
 0x19f   :  { %366 = vmatmul.mubr.msk.f32.vlgmr.msra.gmra.mxu1 %vm220_vm4, %v209_v26 }
 0x25f   :  { %v293_v32 = vpop.f32.mrf.mxu1 }
 0x260   :  { %v294_v33 = vadd.f32 %v293_v32, %v219_v31 }
 0x261   :  { %v367_v34 = vpop.f32.mrf.mxu1 }
 0x262   :  { %298 = vst.msk [vmem:[#allocation3] sm:$0x1] %vm297_vm5, %v294_v33 }
 0x263   :  { %384 = shalt.err (!%p381_p4)
}
 0x264   :  { %308 = dma.vmem_to_hbm [thread:$0]  %s306_s29, 16, %s500_s7, [#allocation4]  }
 0x265   :  { %393 = dma.done.wait [#allocation4], 16  }
 0x266   :  { %394 = vsyncadd [#allocation4], 4294967280 }
 0x267   :  { %312 = vsyncpa [#allocation4], 1 }

</bundles_post_ra>
